<compile_context>
chip_gen: v6e
topology: v6e:2x2x1
jax: 0.10.0
libtpu: 0.0.40
codegen_flags: <defaults>
</compile_context>

<pallas_src>
import math

import jax
import jax.numpy as jnp
from jax.experimental import pallas as pl
from jax.experimental.pallas import tpu as pltpu

# ---- toy dimensions consistent with the module's forward ----
B, S, H = 2, 8, 32          # batch, seq, hidden
NH, DH = 2, 16              # heads, head_dim (NH * DH == H)
FF = 4 * H                  # feed-forward width
V = 100                     # vocab size
NUM_LABELS = 3              # len(label_word_list)
LPAD = 128                  # lane-dense padding of the label dim for the output

# ---- single packed parameter slab: every tensor starts at an 8-row boundary ----
_PARAM_LAYOUT = [
    ("w_qkv", H, 3 * H), ("b_qkv", 1, 3 * H),
    ("w_o", H, H), ("b_o", 1, H),
    ("ln1_g", 1, H), ("ln1_b", 1, H),
    ("w_1", H, FF), ("b_1", 1, FF),
    ("w_2", FF, H), ("b_2", 1, H),
    ("ln2_g", 1, H), ("ln2_b", 1, H),
    ("w_t", H, H), ("b_t", 1, H),            # MLM-head transform dense
    ("ln3_g", 1, H), ("ln3_b", 1, H),        # MLM-head LayerNorm
    ("w_dec", H, LPAD), ("b_dec", 1, LPAD),  # label-word decoder (zero-padded lanes)
]
_OFF, _SHAPE = {}, {}
_row = 0
for _name, _r, _c in _PARAM_LAYOUT:
    _OFF[_name] = _row
    _SHAPE[_name] = (_r, _c)
    _row += -(-_r // 8) * 8                  # round rows up to a multiple of 8
SLAB_ROWS = _row                              # 384 rows x 128 lanes x f32 ≈ 192 KB


def _layernorm(x, gamma, beta, eps=1e-5):
    mu = jnp.mean(x, axis=-1, keepdims=True)
    var = jnp.mean((x - mu) ** 2, axis=-1, keepdims=True)
    return (x - mu) * jax.lax.rsqrt(var + eps) * gamma + beta


def probe_kernel(x_ref, mask_ref, slab_ref, out_ref):
    def param(name):
        r0 = _OFF[name]
        rows, cols = _SHAPE[name]
        return slab_ref[r0:r0 + rows, 0:cols]          # static slice of the one slab

    x = x_ref[...]                                     # (B*S, H): whole batch at once

    # ---- QKV projection: one MXU pass for all B*S tokens ----
    qkv = (jnp.dot(x, param("w_qkv"), preferred_element_type=jnp.float32)
           + param("b_qkv"))                           # (B*S, 3H)

    scale = 1.0 / math.sqrt(DH)
    w_o = param("w_o")                                 # (H, H), loaded once
    attn_rows = []
    for b in range(B):                                 # static: B == 2
        rows = slice(b * S, (b + 1) * S)
        # key-side additive mask bias, broadcast once per sentence (not per head)
        bias = jnp.broadcast_to((mask_ref[b:b + 1, :] - 1.0) * 1e9, (S, S))
        acc = jnp.zeros((S, H), jnp.float32)
        for h in range(NH):                            # static: NH == 2
            q = qkv[rows, h * DH:(h + 1) * DH]
            k = qkv[rows, H + h * DH:H + (h + 1) * DH]
            v = qkv[rows, 2 * H + h * DH:2 * H + (h + 1) * DH]
            # contract last dims directly -> no kh.T, no XLU transpose
            s = jax.lax.dot_general(q, k, (((1,), (1,)), ((), ())),
                                    preferred_element_type=jnp.float32)
            s = s * scale + bias
            s = s - jnp.max(s, axis=-1, keepdims=True)
            e = jnp.exp(s)
            p = e * pl.reciprocal(jnp.sum(e, axis=-1, keepdims=True), approx=True)
            ho = jnp.dot(p, v, preferred_element_type=jnp.float32)       # (S, DH)
            # fold the output projection per head: no lane-axis concatenate
            acc = acc + jnp.dot(ho, w_o[h * DH:(h + 1) * DH, :],
                                preferred_element_type=jnp.float32)
        attn_rows.append(acc)
    attn = jnp.concatenate(attn_rows, axis=0) + param("b_o")             # (B*S, H)

    # ---- residual + post-LN, GELU feed-forward ----
    y = _layernorm(x + attn, param("ln1_g"), param("ln1_b"))
    hdn = jax.nn.gelu(
        jnp.dot(y, param("w_1"), preferred_element_type=jnp.float32) + param("b_1"),
        approximate=True)
    y = _layernorm(
        y + jnp.dot(hdn, param("w_2"), preferred_element_type=jnp.float32) + param("b_2"),
        param("ln2_g"), param("ln2_b"))

    # ---- MLM prediction head (dense + gelu + LN) and label-word decoder ----
    t = jax.nn.gelu(
        jnp.dot(y, param("w_t"), preferred_element_type=jnp.float32) + param("b_t"),
        approximate=True)
    t = _layernorm(t, param("ln3_g"), param("ln3_b"))
    # lane-dense (B*S, 128) store; lanes >= NUM_LABELS are zero (zero-padded decoder)
    out_ref[...] = (jnp.dot(t, param("w_dec"), preferred_element_type=jnp.float32)
                    + param("b_dec"))


def _pack_params(params):
    """Pack every weight/bias/LN tensor into one (SLAB_ROWS, 128) f32 slab."""
    slab = jnp.zeros((SLAB_ROWS, LPAD), jnp.float32)
    for name in _OFF:
        arr = params[name]
        r, c = arr.shape
        slab = slab.at[_OFF[name]:_OFF[name] + r, 0:c].set(arr)
    return slab


def prompt_finetune_probe_forward(params, input_ids, attention_mask,
                                  token_type_ids, mask_pos):
    """Pallas PromptFinetuneProbe.forward -> (B, NUM_LABELS) mask-position logits."""
    # Embedding gathers stay in plain JAX glue.
    x = (params["word_emb"][input_ids]
         + params["pos_emb"][None, :, :]
         + params["type_emb"][token_type_ids]).astype(jnp.float32)
    x = x.reshape(B * S, H)                              # fold batch into rows
    mask_f = attention_mask.astype(jnp.float32).reshape(B, S)
    slab = _pack_params(params)                          # one contiguous weight DMA

    token_logits = pl.pallas_call(
        probe_kernel,
        out_shape=jax.ShapeDtypeStruct((B * S, LPAD), jnp.float32),
        grid=(1,),                                       # whole batch in one step
        in_specs=[
            pl.BlockSpec((B * S, H), lambda i: (0, 0)),
            pl.BlockSpec((B, S), lambda i: (0, 0)),
            pl.BlockSpec((SLAB_ROWS, LPAD), lambda i: (0, 0)),
        ],
        out_specs=pl.BlockSpec((B * S, LPAD), lambda i: (0, 0)),
        compiler_params=pltpu.CompilerParams(dimension_semantics=("arbitrary",)),
    )(x, mask_f, slab)

    token_logits = token_logits[:, :NUM_LABELS].reshape(B, S, NUM_LABELS)
    # PromptFinetuneProbe.forward: pick the logits at the [MASK] position per sentence.
    return token_logits[jnp.arange(B), jnp.squeeze(mask_pos, -1)]


def reference_forward(params, input_ids, attention_mask, token_type_ids, mask_pos):
    """Pure-JAX reference for correctness checking."""
    x = (params["word_emb"][input_ids]
         + params["pos_emb"][None, :, :]
         + params["type_emb"][token_type_ids]).astype(jnp.float32)
    bias = (attention_mask.astype(jnp.float32) - 1.0)[:, None, None, :] * 1e9
    qkv = x @ params["w_qkv"] + params["b_qkv"]
    q, k, v = qkv[..., :H], qkv[..., H:2 * H], qkv[..., 2 * H:]
    heads = lambda t: t.reshape(B, S, NH, DH).transpose(0, 2, 1, 3)
    s = jnp.einsum("bhqd,bhkd->bhqk", heads(q), heads(k)) / math.sqrt(DH) + bias
    p = jax.nn.softmax(s, axis=-1)
    a = jnp.einsum("bhqk,bhkd->bhqd", p, heads(v)).transpose(0, 2, 1, 3).reshape(B, S, H)
    a = a @ params["w_o"] + params["b_o"]
    x = _layernorm(x + a, params["ln1_g"], params["ln1_b"])
    hdn = jax.nn.gelu(x @ params["w_1"] + params["b_1"], approximate=True)
    x = _layernorm(x + hdn @ params["w_2"] + params["b_2"],
                   params["ln2_g"], params["ln2_b"])
    t = jax.nn.gelu(x @ params["w_t"] + params["b_t"], approximate=True)
    t = _layernorm(t, params["ln3_g"], params["ln3_b"])
    logits = t @ params["w_dec"] + params["b_dec"]            # (B, S, NUM_LABELS)
    return logits[jnp.arange(B), jnp.squeeze(mask_pos, -1)]


def init_params(key):
    keys = jax.random.split(key, 15)

    def w(k, shape, scale=0.02):
        return (scale * jax.random.normal(k, shape)).astype(jnp.float32)

    ones = jnp.ones((1, H), jnp.float32)
    zeros = jnp.zeros((1, H), jnp.float32)
    return {
        "word_emb": w(keys[0], (V, H)),
        "pos_emb": w(keys[1], (S, H)),
        "type_emb": w(keys[2], (2, H)),
        "w_qkv": w(keys[3], (H, 3 * H)), "b_qkv": w(keys[4], (1, 3 * H)),
        "w_o": w(keys[5], (H, H)),       "b_o": w(keys[6], (1, H)),
        "ln1_g": ones, "ln1_b": zeros,
        "w_1": w(keys[7], (H, FF)),      "b_1": w(keys[8], (1, FF)),
        "w_2": w(keys[9], (FF, H)),      "b_2": w(keys[10], (1, H)),
        "ln2_g": ones, "ln2_b": zeros,
        "w_t": w(keys[11], (H, H)),      "b_t": w(keys[12], (1, H)),
        "ln3_g": ones, "ln3_b": zeros,
        "w_dec": w(keys[13], (H, NUM_LABELS)),
        "b_dec": w(keys[14], (1, NUM_LABELS)),
    }


if __name__ == "__main__":
    key = jax.random.PRNGKey(0)
    pkey, ikey, tkey = jax.random.split(key, 3)
    params = init_params(pkey)

    input_ids = jax.random.randint(ikey, (B, S), 0, V, dtype=jnp.int32)
    token_type_ids = jax.random.randint(tkey, (B, S), 0, 2, dtype=jnp.int32)
    attention_mask = jnp.ones((B, S), jnp.int32).at[1, 6:].set(0)   # pad 2nd sentence
    mask_pos = jnp.array([[2], [1]], dtype=jnp.int32)               # (B, 1) [MASK] positions

    logits = prompt_finetune_probe_forward(params, input_ids, attention_mask,
                                           token_type_ids, mask_pos)
    logits = jax.block_until_ready(logits)

    ref = reference_forward(params, input_ids, attention_mask, token_type_ids, mask_pos)
    assert logits.shape == (B, NUM_LABELS)
    # tolerance leaves headroom for pl.reciprocal(approx=True) in the softmax
    assert jnp.allclose(logits, ref, atol=2e-3, rtol=2e-3), (logits, ref)
    print("KERNEL_OK")
</pallas_src>

<mosaic_0001>
module attributes {stable_mosaic.version = 11 : i64} {
  func.func @probe_kernel(%arg0: i32, %arg1: memref<16x32xf32, #tpu.memory_space<vmem>>, %arg2: memref<2x8xf32, #tpu.memory_space<vmem>>, %arg3: memref<384x128xf32, #tpu.memory_space<vmem>>, %arg4: memref<16x128xf32, #tpu.memory_space<vmem>>) attributes {dimension_semantics = [#tpu.dimension_semantics<arbitrary>], iteration_bounds = array<i64: 1>, scalar_prefetch = 0 : i64, scratch_operands = 0 : i64, tpu.core_type = #tpu.core_type<tc>, window_params = [{pipeline_mode = #tpu.pipeline_mode<synchronous>, transform_indices = @transform_0, window_bounds = array<i64: 16, 32>}, {pipeline_mode = #tpu.pipeline_mode<synchronous>, transform_indices = @transform_1, window_bounds = array<i64: 2, 8>}, {pipeline_mode = #tpu.pipeline_mode<synchronous>, transform_indices = @transform_2, window_bounds = array<i64: 384, 128>}, {pipeline_mode = #tpu.pipeline_mode<synchronous>, transform_indices = @transform_3, window_bounds = array<i64: 16, 128>}]} {
    %c0 = arith.constant 0 : index
    %c0_0 = arith.constant 0 : index
    %0 = vector.load %arg1[%c0, %c0_0] : memref<16x32xf32, #tpu.memory_space<vmem>>, vector<16x32xf32>
    %c0_1 = arith.constant 0 : index
    %c0_2 = arith.constant 0 : index
    %1 = vector.load %arg3[%c0_1, %c0_2] : memref<384x128xf32, #tpu.memory_space<vmem>>, vector<32x96xf32>
    %cst = arith.constant dense<0.000000e+00> : vector<16x96xf32>
    %2 = tpu.matmul %0, %1, %cst {dimension_numbers = #tpu.dot_dimension_numbers<[1], [0], [0], [1], [0, 0, 1, 1], [], []>} : vector<16x32xf32>, vector<32x96xf32>, vector<16x96xf32> -> vector<16x96xf32>
    %c32 = arith.constant 32 : index
    %c0_3 = arith.constant 0 : index
    %3 = vector.load %arg3[%c32, %c0_3] : memref<384x128xf32, #tpu.memory_space<vmem>>, vector<1x96xf32>
    %4 = vector.broadcast %3 : vector<1x96xf32> to vector<16x96xf32>
    %5 = arith.addf %2, %4 : vector<16x96xf32>
    %c40 = arith.constant 40 : index
    %c0_4 = arith.constant 0 : index
    %6 = vector.load %arg3[%c40, %c0_4] : memref<384x128xf32, #tpu.memory_space<vmem>>, vector<32x32xf32>
    %c0_5 = arith.constant 0 : index
    %c0_6 = arith.constant 0 : index
    %7 = vector.load %arg2[%c0_5, %c0_6] : memref<2x8xf32, #tpu.memory_space<vmem>>, vector<1x8xf32>
    %cst_7 = arith.constant 1.000000e+00 : f32
    %8 = vector.broadcast %cst_7 : f32 to vector<1x8xf32>
    %9 = arith.subf %7, %8 : vector<1x8xf32>
    %cst_8 = arith.constant 1.000000e+09 : f32
    %10 = vector.broadcast %cst_8 : f32 to vector<1x8xf32>
    %11 = arith.mulf %9, %10 : vector<1x8xf32>
    %12 = vector.shape_cast %11 : vector<1x8xf32> to vector<1x8xf32>
    %13 = vector.broadcast %12 : vector<1x8xf32> to vector<8x8xf32>
    %cst_9 = arith.constant 0.000000e+00 : f32
    %14 = vector.broadcast %cst_9 : f32 to vector<8x32xf32>
    %15 = vector.extract_strided_slice %5 {offsets = [0, 0], sizes = [8, 16], strides = [1, 1]} : vector<16x96xf32> to vector<8x16xf32>
    %16 = vector.extract_strided_slice %5 {offsets = [0, 32], sizes = [8, 16], strides = [1, 1]} : vector<16x96xf32> to vector<8x16xf32>
    %17 = vector.extract_strided_slice %5 {offsets = [0, 64], sizes = [8, 16], strides = [1, 1]} : vector<16x96xf32> to vector<8x16xf32>
    %cst_10 = arith.constant dense<0.000000e+00> : vector<8x8xf32>
    %18 = tpu.matmul %15, %16, %cst_10 {dimension_numbers = #tpu.dot_dimension_numbers<[1], [1], [0], [0], [0, 0, 1, 0], [], []>} : vector<8x16xf32>, vector<8x16xf32>, vector<8x8xf32> -> vector<8x8xf32>
    %cst_11 = arith.constant 2.500000e-01 : f32
    %19 = vector.broadcast %cst_11 : f32 to vector<8x8xf32>
    %20 = arith.mulf %18, %19 : vector<8x8xf32>
    %21 = arith.addf %20, %13 : vector<8x8xf32>
    %cst_12 = arith.constant dense<0xFF800000> : vector<8xf32>
    %22 = vector.multi_reduction <maximumf>, %21, %cst_12 [1] : vector<8x8xf32> to vector<8xf32>
    %23 = vector.shape_cast %22 : vector<8xf32> to vector<8x1xf32>
    %24 = vector.broadcast %23 : vector<8x1xf32> to vector<8x8xf32>
    %25 = arith.subf %21, %24 : vector<8x8xf32>
    %26 = math.exp %25 : vector<8x8xf32>
    %cst_13 = arith.constant dense<0.000000e+00> : vector<8xf32>
    %27 = vector.multi_reduction <add>, %26, %cst_13 [1] : vector<8x8xf32> to vector<8xf32>
    %28 = vector.shape_cast %27 : vector<8xf32> to vector<8x1xf32>
    %29 = tpu.reciprocal %28 {approx = true} : vector<8x1xf32> -> vector<8x1xf32>
    %30 = vector.broadcast %29 : vector<8x1xf32> to vector<8x8xf32>
    %31 = arith.mulf %26, %30 : vector<8x8xf32>
    %cst_14 = arith.constant dense<0.000000e+00> : vector<8x16xf32>
    %32 = tpu.matmul %31, %17, %cst_14 {dimension_numbers = #tpu.dot_dimension_numbers<[1], [0], [0], [1], [0, 0, 1, 1], [], []>} : vector<8x8xf32>, vector<8x16xf32>, vector<8x16xf32> -> vector<8x16xf32>
    %33 = vector.extract_strided_slice %6 {offsets = [0, 0], sizes = [16, 32], strides = [1, 1]} : vector<32x32xf32> to vector<16x32xf32>
    %cst_15 = arith.constant dense<0.000000e+00> : vector<8x32xf32>
    %34 = tpu.matmul %32, %33, %cst_15 {dimension_numbers = #tpu.dot_dimension_numbers<[1], [0], [0], [1], [0, 0, 1, 1], [], []>} : vector<8x16xf32>, vector<16x32xf32>, vector<8x32xf32> -> vector<8x32xf32>
    %35 = arith.addf %14, %34 : vector<8x32xf32>
    %36 = vector.extract_strided_slice %5 {offsets = [0, 16], sizes = [8, 16], strides = [1, 1]} : vector<16x96xf32> to vector<8x16xf32>
    %37 = vector.extract_strided_slice %5 {offsets = [0, 48], sizes = [8, 16], strides = [1, 1]} : vector<16x96xf32> to vector<8x16xf32>
    %38 = vector.extract_strided_slice %5 {offsets = [0, 80], sizes = [8, 16], strides = [1, 1]} : vector<16x96xf32> to vector<8x16xf32>
    %cst_16 = arith.constant dense<0.000000e+00> : vector<8x8xf32>
    %39 = tpu.matmul %36, %37, %cst_16 {dimension_numbers = #tpu.dot_dimension_numbers<[1], [1], [0], [0], [0, 0, 1, 0], [], []>} : vector<8x16xf32>, vector<8x16xf32>, vector<8x8xf32> -> vector<8x8xf32>
    %cst_17 = arith.constant 2.500000e-01 : f32
    %40 = vector.broadcast %cst_17 : f32 to vector<8x8xf32>
    %41 = arith.mulf %39, %40 : vector<8x8xf32>
    %42 = arith.addf %41, %13 : vector<8x8xf32>
    %cst_18 = arith.constant dense<0xFF800000> : vector<8xf32>
    %43 = vector.multi_reduction <maximumf>, %42, %cst_18 [1] : vector<8x8xf32> to vector<8xf32>
    %44 = vector.shape_cast %43 : vector<8xf32> to vector<8x1xf32>
    %45 = vector.broadcast %44 : vector<8x1xf32> to vector<8x8xf32>
    %46 = arith.subf %42, %45 : vector<8x8xf32>
    %47 = math.exp %46 : vector<8x8xf32>
    %cst_19 = arith.constant dense<0.000000e+00> : vector<8xf32>
    %48 = vector.multi_reduction <add>, %47, %cst_19 [1] : vector<8x8xf32> to vector<8xf32>
    %49 = vector.shape_cast %48 : vector<8xf32> to vector<8x1xf32>
    %50 = tpu.reciprocal %49 {approx = true} : vector<8x1xf32> -> vector<8x1xf32>
    %51 = vector.broadcast %50 : vector<8x1xf32> to vector<8x8xf32>
    %52 = arith.mulf %47, %51 : vector<8x8xf32>
    %cst_20 = arith.constant dense<0.000000e+00> : vector<8x16xf32>
    %53 = tpu.matmul %52, %38, %cst_20 {dimension_numbers = #tpu.dot_dimension_numbers<[1], [0], [0], [1], [0, 0, 1, 1], [], []>} : vector<8x8xf32>, vector<8x16xf32>, vector<8x16xf32> -> vector<8x16xf32>
    %54 = vector.extract_strided_slice %6 {offsets = [16, 0], sizes = [16, 32], strides = [1, 1]} : vector<32x32xf32> to vector<16x32xf32>
    %cst_21 = arith.constant dense<0.000000e+00> : vector<8x32xf32>
    %55 = tpu.matmul %53, %54, %cst_21 {dimension_numbers = #tpu.dot_dimension_numbers<[1], [0], [0], [1], [0, 0, 1, 1], [], []>} : vector<8x16xf32>, vector<16x32xf32>, vector<8x32xf32> -> vector<8x32xf32>
    %56 = arith.addf %35, %55 : vector<8x32xf32>
    %c1 = arith.constant 1 : index
    %c0_22 = arith.constant 0 : index
    %57 = vector.load %arg2[%c1, %c0_22] : memref<2x8xf32, #tpu.memory_space<vmem>>, vector<1x8xf32>
    %cst_23 = arith.constant 1.000000e+00 : f32
    %58 = vector.broadcast %cst_23 : f32 to vector<1x8xf32>
    %59 = arith.subf %57, %58 : vector<1x8xf32>
    %cst_24 = arith.constant 1.000000e+09 : f32
    %60 = vector.broadcast %cst_24 : f32 to vector<1x8xf32>
    %61 = arith.mulf %59, %60 : vector<1x8xf32>
    %62 = vector.shape_cast %61 : vector<1x8xf32> to vector<1x8xf32>
    %63 = vector.broadcast %62 : vector<1x8xf32> to vector<8x8xf32>
    %cst_25 = arith.constant 0.000000e+00 : f32
    %64 = vector.broadcast %cst_25 : f32 to vector<8x32xf32>
    %65 = vector.extract_strided_slice %5 {offsets = [8, 0], sizes = [8, 16], strides = [1, 1]} : vector<16x96xf32> to vector<8x16xf32>
    %66 = vector.extract_strided_slice %5 {offsets = [8, 32], sizes = [8, 16], strides = [1, 1]} : vector<16x96xf32> to vector<8x16xf32>
    %67 = vector.extract_strided_slice %5 {offsets = [8, 64], sizes = [8, 16], strides = [1, 1]} : vector<16x96xf32> to vector<8x16xf32>
    %cst_26 = arith.constant dense<0.000000e+00> : vector<8x8xf32>
    %68 = tpu.matmul %65, %66, %cst_26 {dimension_numbers = #tpu.dot_dimension_numbers<[1], [1], [0], [0], [0, 0, 1, 0], [], []>} : vector<8x16xf32>, vector<8x16xf32>, vector<8x8xf32> -> vector<8x8xf32>
    %cst_27 = arith.constant 2.500000e-01 : f32
    %69 = vector.broadcast %cst_27 : f32 to vector<8x8xf32>
    %70 = arith.mulf %68, %69 : vector<8x8xf32>
    %71 = arith.addf %70, %63 : vector<8x8xf32>
    %cst_28 = arith.constant dense<0xFF800000> : vector<8xf32>
    %72 = vector.multi_reduction <maximumf>, %71, %cst_28 [1] : vector<8x8xf32> to vector<8xf32>
    %73 = vector.shape_cast %72 : vector<8xf32> to vector<8x1xf32>
    %74 = vector.broadcast %73 : vector<8x1xf32> to vector<8x8xf32>
    %75 = arith.subf %71, %74 : vector<8x8xf32>
    %76 = math.exp %75 : vector<8x8xf32>
    %cst_29 = arith.constant dense<0.000000e+00> : vector<8xf32>
    %77 = vector.multi_reduction <add>, %76, %cst_29 [1] : vector<8x8xf32> to vector<8xf32>
    %78 = vector.shape_cast %77 : vector<8xf32> to vector<8x1xf32>
    %79 = tpu.reciprocal %78 {approx = true} : vector<8x1xf32> -> vector<8x1xf32>
    %80 = vector.broadcast %79 : vector<8x1xf32> to vector<8x8xf32>
    %81 = arith.mulf %76, %80 : vector<8x8xf32>
    %cst_30 = arith.constant dense<0.000000e+00> : vector<8x16xf32>
    %82 = tpu.matmul %81, %67, %cst_30 {dimension_numbers = #tpu.dot_dimension_numbers<[1], [0], [0], [1], [0, 0, 1, 1], [], []>} : vector<8x8xf32>, vector<8x16xf32>, vector<8x16xf32> -> vector<8x16xf32>
    %83 = vector.extract_strided_slice %6 {offsets = [0, 0], sizes = [16, 32], strides = [1, 1]} : vector<32x32xf32> to vector<16x32xf32>
    %cst_31 = arith.constant dense<0.000000e+00> : vector<8x32xf32>
    %84 = tpu.matmul %82, %83, %cst_31 {dimension_numbers = #tpu.dot_dimension_numbers<[1], [0], [0], [1], [0, 0, 1, 1], [], []>} : vector<8x16xf32>, vector<16x32xf32>, vector<8x32xf32> -> vector<8x32xf32>
    %85 = arith.addf %64, %84 : vector<8x32xf32>
    %86 = vector.extract_strided_slice %5 {offsets = [8, 16], sizes = [8, 16], strides = [1, 1]} : vector<16x96xf32> to vector<8x16xf32>
    %87 = vector.extract_strided_slice %5 {offsets = [8, 48], sizes = [8, 16], strides = [1, 1]} : vector<16x96xf32> to vector<8x16xf32>
    %88 = vector.extract_strided_slice %5 {offsets = [8, 80], sizes = [8, 16], strides = [1, 1]} : vector<16x96xf32> to vector<8x16xf32>
    %cst_32 = arith.constant dense<0.000000e+00> : vector<8x8xf32>
    %89 = tpu.matmul %86, %87, %cst_32 {dimension_numbers = #tpu.dot_dimension_numbers<[1], [1], [0], [0], [0, 0, 1, 0], [], []>} : vector<8x16xf32>, vector<8x16xf32>, vector<8x8xf32> -> vector<8x8xf32>
    %cst_33 = arith.constant 2.500000e-01 : f32
    %90 = vector.broadcast %cst_33 : f32 to vector<8x8xf32>
    %91 = arith.mulf %89, %90 : vector<8x8xf32>
    %92 = arith.addf %91, %63 : vector<8x8xf32>
    %cst_34 = arith.constant dense<0xFF800000> : vector<8xf32>
    %93 = vector.multi_reduction <maximumf>, %92, %cst_34 [1] : vector<8x8xf32> to vector<8xf32>
    %94 = vector.shape_cast %93 : vector<8xf32> to vector<8x1xf32>
    %95 = vector.broadcast %94 : vector<8x1xf32> to vector<8x8xf32>
    %96 = arith.subf %92, %95 : vector<8x8xf32>
    %97 = math.exp %96 : vector<8x8xf32>
    %cst_35 = arith.constant dense<0.000000e+00> : vector<8xf32>
    %98 = vector.multi_reduction <add>, %97, %cst_35 [1] : vector<8x8xf32> to vector<8xf32>
    %99 = vector.shape_cast %98 : vector<8xf32> to vector<8x1xf32>
    %100 = tpu.reciprocal %99 {approx = true} : vector<8x1xf32> -> vector<8x1xf32>
    %101 = vector.broadcast %100 : vector<8x1xf32> to vector<8x8xf32>
    %102 = arith.mulf %97, %101 : vector<8x8xf32>
    %cst_36 = arith.constant dense<0.000000e+00> : vector<8x16xf32>
    %103 = tpu.matmul %102, %88, %cst_36 {dimension_numbers = #tpu.dot_dimension_numbers<[1], [0], [0], [1], [0, 0, 1, 1], [], []>} : vector<8x8xf32>, vector<8x16xf32>, vector<8x16xf32> -> vector<8x16xf32>
    %104 = vector.extract_strided_slice %6 {offsets = [16, 0], sizes = [16, 32], strides = [1, 1]} : vector<32x32xf32> to vector<16x32xf32>
    %cst_37 = arith.constant dense<0.000000e+00> : vector<8x32xf32>
    %105 = tpu.matmul %103, %104, %cst_37 {dimension_numbers = #tpu.dot_dimension_numbers<[1], [0], [0], [1], [0, 0, 1, 1], [], []>} : vector<8x16xf32>, vector<16x32xf32>, vector<8x32xf32> -> vector<8x32xf32>
    %106 = arith.addf %85, %105 : vector<8x32xf32>
    %107 = tpu.concatenate %56, %106 in 0 : vector<8x32xf32>, vector<8x32xf32> -> vector<16x32xf32>
    %c72 = arith.constant 72 : index
    %c0_38 = arith.constant 0 : index
    %108 = vector.load %arg3[%c72, %c0_38] : memref<384x128xf32, #tpu.memory_space<vmem>>, vector<1x32xf32>
    %109 = vector.broadcast %108 : vector<1x32xf32> to vector<16x32xf32>
    %110 = arith.addf %107, %109 : vector<16x32xf32>
    %111 = arith.addf %0, %110 : vector<16x32xf32>
    %c80 = arith.constant 80 : index
    %c0_39 = arith.constant 0 : index
    %112 = vector.load %arg3[%c80, %c0_39] : memref<384x128xf32, #tpu.memory_space<vmem>>, vector<1x32xf32>
    %c88 = arith.constant 88 : index
    %c0_40 = arith.constant 0 : index
    %113 = vector.load %arg3[%c88, %c0_40] : memref<384x128xf32, #tpu.memory_space<vmem>>, vector<1x32xf32>
    %cst_41 = arith.constant dense<0.000000e+00> : vector<16xf32>
    %114 = vector.multi_reduction <add>, %111, %cst_41 [1] : vector<16x32xf32> to vector<16xf32>
    %115 = vector.shape_cast %114 : vector<16xf32> to vector<16x1xf32>
    %cst_42 = arith.constant 3.200000e+01 : f32
    %116 = vector.broadcast %cst_42 : f32 to vector<16x1xf32>
    %117 = arith.divf %115, %116 : vector<16x1xf32>
    %118 = vector.broadcast %117 : vector<16x1xf32> to vector<16x32xf32>
    %119 = arith.subf %111, %118 : vector<16x32xf32>
    %120 = arith.mulf %119, %119 : vector<16x32xf32>
    %cst_43 = arith.constant dense<0.000000e+00> : vector<16xf32>
    %121 = vector.multi_reduction <add>, %120, %cst_43 [1] : vector<16x32xf32> to vector<16xf32>
    %122 = vector.shape_cast %121 : vector<16xf32> to vector<16x1xf32>
    %cst_44 = arith.constant 3.200000e+01 : f32
    %123 = vector.broadcast %cst_44 : f32 to vector<16x1xf32>
    %124 = arith.divf %122, %123 : vector<16x1xf32>
    %125 = vector.broadcast %117 : vector<16x1xf32> to vector<16x32xf32>
    %126 = arith.subf %111, %125 : vector<16x32xf32>
    %cst_45 = arith.constant 9.99999974E-6 : f32
    %127 = vector.broadcast %cst_45 : f32 to vector<16x1xf32>
    %128 = arith.addf %124, %127 : vector<16x1xf32>
    %129 = math.rsqrt %128 : vector<16x1xf32>
    %130 = vector.broadcast %129 : vector<16x1xf32> to vector<16x32xf32>
    %131 = arith.mulf %126, %130 : vector<16x32xf32>
    %132 = vector.broadcast %112 : vector<1x32xf32> to vector<16x32xf32>
    %133 = arith.mulf %131, %132 : vector<16x32xf32>
    %134 = vector.broadcast %113 : vector<1x32xf32> to vector<16x32xf32>
    %135 = arith.addf %133, %134 : vector<16x32xf32>
    %c96 = arith.constant 96 : index
    %c0_46 = arith.constant 0 : index
    %136 = vector.load %arg3[%c96, %c0_46] : memref<384x128xf32, #tpu.memory_space<vmem>>, vector<32x128xf32>
    %cst_47 = arith.constant dense<0.000000e+00> : vector<16x128xf32>
    %137 = tpu.matmul %135, %136, %cst_47 {dimension_numbers = #tpu.dot_dimension_numbers<[1], [0], [0], [1], [0, 0, 1, 1], [], []>} : vector<16x32xf32>, vector<32x128xf32>, vector<16x128xf32> -> vector<16x128xf32>
    %c128 = arith.constant 128 : index
    %c0_48 = arith.constant 0 : index
    %138 = vector.load %arg3[%c128, %c0_48] : memref<384x128xf32, #tpu.memory_space<vmem>>, vector<1x128xf32>
    %139 = vector.broadcast %138 : vector<1x128xf32> to vector<16x128xf32>
    %140 = arith.addf %137, %139 : vector<16x128xf32>
    %141 = arith.mulf %140, %140 : vector<16x128xf32>
    %142 = arith.mulf %140, %141 : vector<16x128xf32>
    %cst_49 = arith.constant 4.471500e-02 : f32
    %143 = vector.broadcast %cst_49 : f32 to vector<16x128xf32>
    %144 = arith.mulf %143, %142 : vector<16x128xf32>
    %145 = arith.addf %140, %144 : vector<16x128xf32>
    %cst_50 = arith.constant 0.797884583 : f32
    %146 = vector.broadcast %cst_50 : f32 to vector<16x128xf32>
    %147 = arith.mulf %146, %145 : vector<16x128xf32>
    %148 = math.tanh %147 : vector<16x128xf32>
    %cst_51 = arith.constant 1.000000e+00 : f32
    %149 = vector.broadcast %cst_51 : f32 to vector<16x128xf32>
    %150 = arith.addf %149, %148 : vector<16x128xf32>
    %cst_52 = arith.constant 5.000000e-01 : f32
    %151 = vector.broadcast %cst_52 : f32 to vector<16x128xf32>
    %152 = arith.mulf %151, %150 : vector<16x128xf32>
    %153 = arith.mulf %140, %152 : vector<16x128xf32>
    %c136 = arith.constant 136 : index
    %c0_53 = arith.constant 0 : index
    %154 = vector.load %arg3[%c136, %c0_53] : memref<384x128xf32, #tpu.memory_space<vmem>>, vector<128x32xf32>
    %cst_54 = arith.constant dense<0.000000e+00> : vector<16x32xf32>
    %155 = tpu.matmul %153, %154, %cst_54 {dimension_numbers = #tpu.dot_dimension_numbers<[1], [0], [0], [1], [0, 0, 1, 1], [], []>} : vector<16x128xf32>, vector<128x32xf32>, vector<16x32xf32> -> vector<16x32xf32>
    %156 = arith.addf %135, %155 : vector<16x32xf32>
    %c264 = arith.constant 264 : index
    %c0_55 = arith.constant 0 : index
    %157 = vector.load %arg3[%c264, %c0_55] : memref<384x128xf32, #tpu.memory_space<vmem>>, vector<1x32xf32>
    %158 = vector.broadcast %157 : vector<1x32xf32> to vector<16x32xf32>
    %159 = arith.addf %156, %158 : vector<16x32xf32>
    %c272 = arith.constant 272 : index
    %c0_56 = arith.constant 0 : index
    %160 = vector.load %arg3[%c272, %c0_56] : memref<384x128xf32, #tpu.memory_space<vmem>>, vector<1x32xf32>
    %c280 = arith.constant 280 : index
    %c0_57 = arith.constant 0 : index
    %161 = vector.load %arg3[%c280, %c0_57] : memref<384x128xf32, #tpu.memory_space<vmem>>, vector<1x32xf32>
    %cst_58 = arith.constant dense<0.000000e+00> : vector<16xf32>
    %162 = vector.multi_reduction <add>, %159, %cst_58 [1] : vector<16x32xf32> to vector<16xf32>
    %163 = vector.shape_cast %162 : vector<16xf32> to vector<16x1xf32>
    %cst_59 = arith.constant 3.200000e+01 : f32
    %164 = vector.broadcast %cst_59 : f32 to vector<16x1xf32>
    %165 = arith.divf %163, %164 : vector<16x1xf32>
    %166 = vector.broadcast %165 : vector<16x1xf32> to vector<16x32xf32>
    %167 = arith.subf %159, %166 : vector<16x32xf32>
    %168 = arith.mulf %167, %167 : vector<16x32xf32>
    %cst_60 = arith.constant dense<0.000000e+00> : vector<16xf32>
    %169 = vector.multi_reduction <add>, %168, %cst_60 [1] : vector<16x32xf32> to vector<16xf32>
    %170 = vector.shape_cast %169 : vector<16xf32> to vector<16x1xf32>
    %cst_61 = arith.constant 3.200000e+01 : f32
    %171 = vector.broadcast %cst_61 : f32 to vector<16x1xf32>
    %172 = arith.divf %170, %171 : vector<16x1xf32>
    %173 = vector.broadcast %165 : vector<16x1xf32> to vector<16x32xf32>
    %174 = arith.subf %159, %173 : vector<16x32xf32>
    %cst_62 = arith.constant 9.99999974E-6 : f32
    %175 = vector.broadcast %cst_62 : f32 to vector<16x1xf32>
    %176 = arith.addf %172, %175 : vector<16x1xf32>
    %177 = math.rsqrt %176 : vector<16x1xf32>
    %178 = vector.broadcast %177 : vector<16x1xf32> to vector<16x32xf32>
    %179 = arith.mulf %174, %178 : vector<16x32xf32>
    %180 = vector.broadcast %160 : vector<1x32xf32> to vector<16x32xf32>
    %181 = arith.mulf %179, %180 : vector<16x32xf32>
    %182 = vector.broadcast %161 : vector<1x32xf32> to vector<16x32xf32>
    %183 = arith.addf %181, %182 : vector<16x32xf32>
    %c288 = arith.constant 288 : index
    %c0_63 = arith.constant 0 : index
    %184 = vector.load %arg3[%c288, %c0_63] : memref<384x128xf32, #tpu.memory_space<vmem>>, vector<32x32xf32>
    %cst_64 = arith.constant dense<0.000000e+00> : vector<16x32xf32>
    %185 = tpu.matmul %183, %184, %cst_64 {dimension_numbers = #tpu.dot_dimension_numbers<[1], [0], [0], [1], [0, 0, 1, 1], [], []>} : vector<16x32xf32>, vector<32x32xf32>, vector<16x32xf32> -> vector<16x32xf32>
    %c320 = arith.constant 320 : index
    %c0_65 = arith.constant 0 : index
    %186 = vector.load %arg3[%c320, %c0_65] : memref<384x128xf32, #tpu.memory_space<vmem>>, vector<1x32xf32>
    %187 = vector.broadcast %186 : vector<1x32xf32> to vector<16x32xf32>
    %188 = arith.addf %185, %187 : vector<16x32xf32>
    %189 = arith.mulf %188, %188 : vector<16x32xf32>
    %190 = arith.mulf %188, %189 : vector<16x32xf32>
    %cst_66 = arith.constant 4.471500e-02 : f32
    %191 = vector.broadcast %cst_66 : f32 to vector<16x32xf32>
    %192 = arith.mulf %191, %190 : vector<16x32xf32>
    %193 = arith.addf %188, %192 : vector<16x32xf32>
    %cst_67 = arith.constant 0.797884583 : f32
    %194 = vector.broadcast %cst_67 : f32 to vector<16x32xf32>
    %195 = arith.mulf %194, %193 : vector<16x32xf32>
    %196 = math.tanh %195 : vector<16x32xf32>
    %cst_68 = arith.constant 1.000000e+00 : f32
    %197 = vector.broadcast %cst_68 : f32 to vector<16x32xf32>
    %198 = arith.addf %197, %196 : vector<16x32xf32>
    %cst_69 = arith.constant 5.000000e-01 : f32
    %199 = vector.broadcast %cst_69 : f32 to vector<16x32xf32>
    %200 = arith.mulf %199, %198 : vector<16x32xf32>
    %201 = arith.mulf %188, %200 : vector<16x32xf32>
    %c328 = arith.constant 328 : index
    %c0_70 = arith.constant 0 : index
    %202 = vector.load %arg3[%c328, %c0_70] : memref<384x128xf32, #tpu.memory_space<vmem>>, vector<1x32xf32>
    %c336 = arith.constant 336 : index
    %c0_71 = arith.constant 0 : index
    %203 = vector.load %arg3[%c336, %c0_71] : memref<384x128xf32, #tpu.memory_space<vmem>>, vector<1x32xf32>
    %cst_72 = arith.constant dense<0.000000e+00> : vector<16xf32>
    %204 = vector.multi_reduction <add>, %201, %cst_72 [1] : vector<16x32xf32> to vector<16xf32>
    %205 = vector.shape_cast %204 : vector<16xf32> to vector<16x1xf32>
    %cst_73 = arith.constant 3.200000e+01 : f32
    %206 = vector.broadcast %cst_73 : f32 to vector<16x1xf32>
    %207 = arith.divf %205, %206 : vector<16x1xf32>
    %208 = vector.broadcast %207 : vector<16x1xf32> to vector<16x32xf32>
    %209 = arith.subf %201, %208 : vector<16x32xf32>
    %210 = arith.mulf %209, %209 : vector<16x32xf32>
    %cst_74 = arith.constant dense<0.000000e+00> : vector<16xf32>
    %211 = vector.multi_reduction <add>, %210, %cst_74 [1] : vector<16x32xf32> to vector<16xf32>
    %212 = vector.shape_cast %211 : vector<16xf32> to vector<16x1xf32>
    %cst_75 = arith.constant 3.200000e+01 : f32
    %213 = vector.broadcast %cst_75 : f32 to vector<16x1xf32>
    %214 = arith.divf %212, %213 : vector<16x1xf32>
    %215 = vector.broadcast %207 : vector<16x1xf32> to vector<16x32xf32>
    %216 = arith.subf %201, %215 : vector<16x32xf32>
    %cst_76 = arith.constant 9.99999974E-6 : f32
    %217 = vector.broadcast %cst_76 : f32 to vector<16x1xf32>
    %218 = arith.addf %214, %217 : vector<16x1xf32>
    %219 = math.rsqrt %218 : vector<16x1xf32>
    %220 = vector.broadcast %219 : vector<16x1xf32> to vector<16x32xf32>
    %221 = arith.mulf %216, %220 : vector<16x32xf32>
    %222 = vector.broadcast %202 : vector<1x32xf32> to vector<16x32xf32>
    %223 = arith.mulf %221, %222 : vector<16x32xf32>
    %224 = vector.broadcast %203 : vector<1x32xf32> to vector<16x32xf32>
    %225 = arith.addf %223, %224 : vector<16x32xf32>
    %c344 = arith.constant 344 : index
    %c0_77 = arith.constant 0 : index
    %226 = vector.load %arg3[%c344, %c0_77] : memref<384x128xf32, #tpu.memory_space<vmem>>, vector<32x128xf32>
    %cst_78 = arith.constant dense<0.000000e+00> : vector<16x128xf32>
    %227 = tpu.matmul %225, %226, %cst_78 {dimension_numbers = #tpu.dot_dimension_numbers<[1], [0], [0], [1], [0, 0, 1, 1], [], []>} : vector<16x32xf32>, vector<32x128xf32>, vector<16x128xf32> -> vector<16x128xf32>
    %c376 = arith.constant 376 : index
    %c0_79 = arith.constant 0 : index
    %228 = vector.load %arg3[%c376, %c0_79] : memref<384x128xf32, #tpu.memory_space<vmem>>, vector<1x128xf32>
    %229 = vector.broadcast %228 : vector<1x128xf32> to vector<16x128xf32>
    %230 = arith.addf %227, %229 : vector<16x128xf32>
    %c0_80 = arith.constant 0 : index
    %c0_81 = arith.constant 0 : index
    %231 = vector.load %arg4[%c0_80, %c0_81] : memref<16x128xf32, #tpu.memory_space<vmem>>, vector<16x128xf32>
    tpu.vector_store %arg4[%c0_80, %c0_81], %230 {strides = array<i32>} : memref<16x128xf32, #tpu.memory_space<vmem>>, vector<16x128xf32>,
    return
  }
  func.func @transform_0(%arg0: i32) -> (i32, i32) {
    %c0_i32 = arith.constant 0 : i32
    %c0_i32_0 = arith.constant 0 : i32
    %c0_i32_1 = arith.constant 0 : i32
    return %c0_i32, %c0_i32_0 : i32, i32
  }
  func.func @transform_1(%arg0: i32) -> (i32, i32) {
    %c0_i32 = arith.constant 0 : i32
    %c0_i32_0 = arith.constant 0 : i32
    %c0_i32_1 = arith.constant 0 : i32
    return %c0_i32, %c0_i32_0 : i32, i32
  }
  func.func @transform_2(%arg0: i32) -> (i32, i32) {
    %c0_i32 = arith.constant 0 : i32
    %c0_i32_0 = arith.constant 0 : i32
    %c0_i32_1 = arith.constant 0 : i32
    return %c0_i32, %c0_i32_0 : i32, i32
  }
  func.func @transform_3(%arg0: i32) -> (i32, i32) {
    %c0_i32 = arith.constant 0 : i32
    %c0_i32_0 = arith.constant 0 : i32
    %c0_i32_1 = arith.constant 0 : i32
    return %c0_i32, %c0_i32_0 : i32, i32
  }
}

</mosaic_0001>

<bundles_post_ra>
// kernel: tpu_custom_call.1
= control target key start
LH: loop header
LB: loop body
LE: loop exit
PB: predicated region body
PF: predicated region fallthrough
CT: control target
= control target key end

     0   :  { %8 = vsyncpa [#allocation3], 0  ;;  %s2262_s0 = inlined_call_operand.hbm [shape: f32[16,32], index: 0, kind: input, shape index: {}]   ;;  %s2263_s1 = inlined_call_operand.hbm [shape: f32[2,8], index: 1, kind: input, shape index: {}]   ;;  %s2264_s2 = inlined_call_operand.hbm [shape: f32[384,128], index: 2, kind: input, shape index: {}]   ;;  %s2265_s3 = inlined_call_operand.hbm [shape: f32[16,128], index: 3, kind: output, shape index: {}]  }
   0x1   :  { %9 = vsyncpa [#allocation6], 0 }
   0x2   :  { %10 = vsyncpa [#allocation4], 0  ;;  %s2071_s12 = smov [#allocation5]   ;;  %s2072_s14 = smov [#allocation2]  }
   0x3   :  { %s29_s13 = sshll.u32 %s2071_s12, 4  ;;  %s16_s15 = sshll.u32 %s2072_s14, 4  ;;  %s30_s13 = int_to_ptr.vmem [resolvable:$true] %s29_s13  ;;  %s17_s15 = int_to_ptr.vmem [resolvable:$true] %s16_s15 }
   0x4   :  { %s1993_s16 = scalar_lea.vmem %s30_s13, 32  ;;  %p1998_p1 = scmp.lt.s32.totalorder %s30_s13, %s30_s13 }
   0x5   :  { %p1994_p0 = scmp.ne.s32.totalorder %s30_s13, %s1993_s16  ;;  %p1999_p2 = scmp.lt.s32.totalorder %s1993_s16, %s1993_s16 }
   0x7   :  { %p2000_p3 = por %p1999_p2, %p1998_p1 }
   0x9   :  { %p2001_p4 = pnand %p2000_p3, %p1994_p0 }
   0xb   :  { %2004 = shalt.err (!%p2001_p4)
}
   0xc   :  { %32 = dma.hbm_to_vmem [thread:$0]  %s2263_s1, 32, %s30_s13, [#allocation6]  }
   0xd   :  { %s2013_s19 = scalar_lea.vmem %s17_s15, 256  ;;  %p2018_p6 = scmp.lt.s32.totalorder %s17_s15, %s17_s15 }
   0xe   :  { %p2014_p5 = scmp.ne.s32.totalorder %s17_s15, %s2013_s19  ;;  %p2019_p7 = scmp.lt.s32.totalorder %s2013_s19, %s2013_s19 }
  0x10   :  { %p2020_p8 = por %p2019_p7, %p2018_p6 }
  0x12   :  { %p2021_p9 = pnand %p2020_p8, %p2014_p5 }
  0x14   :  { %2024 = shalt.err (!%p2021_p9)
}
  0x15   :  { %s2073_s20 = smov 128   ;;  %s2074_s21 = smov 8  }
  0x16   :  { %22 = dma.hbm_to_vmem [thread:$0]  %s2262_s0, 256, %s17_s15, [#allocation3], %s2073_s20, %s2073_s20, %s2074_s21  }
  0x17   :  { %s2075_s24 = smov [#allocation7]  }
  0x18   :  { %s38_s25 = sshll.u32 %s2075_s24, 4  ;;  %s39_s25 = int_to_ptr.vmem [resolvable:$true] %s38_s25 }
  0x19   :  { %s2033_s1 = scalar_lea.vmem %s39_s25, 6144  ;;  %p2038_p11 = scmp.lt.s32.totalorder %s39_s25, %s39_s25 }
  0x1a   :  { %p2034_p10 = scmp.ne.s32.totalorder %s39_s25, %s2033_s1  ;;  %p2039_p12 = scmp.lt.s32.totalorder %s2033_s1, %s2033_s1 }
  0x1c   :  { %p2040_p13 = por %p2039_p12, %p2038_p11 }
  0x1e   :  { %p2041_p0 = pnand %p2040_p13, %p2034_p10 }
  0x20   :  { %2044 = shalt.err (!%p2041_p0)
}
  0x21   :  { %44 = dma.hbm_to_vmem [thread:$0]  %s2264_s2, 6144, %s39_s25, [#allocation6], %s2073_s20, %s2073_s20, %s2074_s21  }
  0x22   :  { %2065 = dma.done.wait [#allocation3], 256  }
  0x23   :  { %2066 = vsyncadd [#allocation3], 4294967040 }
  0x24   :  { %2067 = dma.done.wait [#allocation6], 6176  }
  0x25   :  { %2068 = vsyncadd [#allocation6], 4294961120  ;;  %vm65_vm0 = vcmask 261120   ;;  %v59_v0 = vld [vmem:[#allocation7 + $0x18] sm:$0xff]  ;;  %v58_v1 = vld [vmem:[#allocation7 + $0x10] sm:$0xff]  ;;  %v2076_v6 = vmov 0.0   ;;  %v154_v15 = vlaneseq }
  0x26   :  { %1789 = vmatprep.subr.mxu0 %v59_v0  ;;  %v2119_v2 = vld [vmem:[#allocation2] sm:$0xff]  ;;  %v56_v4 = vld [vmem:[#allocation7] sm:$0xff]  ;;  %v2123_v5 = vld [vmem:[#allocation2 + $0x8] sm:$0xff]  ;;  %1805 = vmatprep.subr.mxu1 %v2076_v6  ;;  %vm2077_vm1 = vmmov 0   ;;  %s2078_s0 = smov 112   ;;  %s2079_s2 = smov 96  }
  0x27   :  { %1790 = vmatpush3.msra.mxu0 %v59_v0  ;;  %v57_v3 = vld [vmem:[#allocation7 + $0x8] sm:$0xff]  ;;  %1797 = vmatprep.mubr.msk.f32.mxu0 %vm65_vm0, %v2119_v2  ;;  %v1681_v7 = vld [vmem:[#allocation7 + $0x20] ss:$0 sm:$0xff]  ;;  %s2080_s28 = smov 80   ;;  %vm161_vm2 = vcmask 130048   ;;  %v2148_v18 = vshrl.u32 %v154_v15, 7 }
  0x28   :  { %1791 = vmatprep.subr.mxu0 %v58_v1  ;;  %1807 = vmatprep.mubr.msk.f32.mxu1 %vm2077_vm1, %v2076_v6  ;;  %v151_v16 = vld [vmem:[#allocation5] sm:$0x1]  ;;  %vm238_vm3 = vcmask 64512   ;;  %s2081_s29 = smov 48   ;;  %s2082_s30 = smov 64   ;;  %v2170_v50 = vld [vmem:[#allocation7 + $0x30] sm:$0xff] }
  0x29   :  { %1792 = vmatpush3.msra.mxu0 %v58_v1  ;;  %v1684_v17 = vadd.f32 -1.0, %v151_v16  ;;  %v156_v20 = vsub.s32 0, %v2148_v18  ;;  %v2177_v51 = vld [vmem:[#allocation7 + $0x28] sm:$0xff]  ;;  %v150_v52 = vld [vmem:[#allocation7 + $0x40] sm:$0xff]  ;;  %v149_v53 = vld [vmem:[#allocation7 + $0x38] sm:$0xff]  ;;  %s2083_s4 = smov [#allocation8]  }
  0x2a   :  { %1793 = vmatprep.subr.mxu0 %v57_v3  ;;  %v639_v61 = vld [vmem:[#allocation5 + $0x1] sm:$0x1]  ;;  %v2207_v18 = vld [vmem:[#allocation7 + $0x48] ss:$0 sm:$0xff]  ;;  %s1668_s5 = sshll.u32 %s2083_s4, 4  ;;  %s1669_s5 = int_to_ptr.vmem [resolvable:$true] %s1668_s5 }
  0x2b   :  { %1794 = vmatpush3.msra.mxu0 %v57_v3  ;;  %v153_v19 = vmul.f32 1e+09, %v1684_v17  ;;  %v1693_v62 = vadd.f32 -1.0, %v639_v61  ;;  %s2045_s6 = scalar_lea.vmem %s1669_s5, 256  ;;  %p2050_p2 = scmp.lt.s32.totalorder %s1669_s5, %s1669_s5 }
  0x2c   :  { %1795 = vmatprep.subr.mxu0 %v56_v4  ;;  %p2046_p1 = scmp.ne.s32.totalorder %s1669_s5, %s2045_s6  ;;  %p2051_p3 = scmp.lt.s32.totalorder %s2045_s6, %s2045_s6 }
  0x2d   :  { %1796 = vmatpush3.msra.mxu0 %v56_v4  ;;  %v157_v21 = vrot.slane %v153_v19, %v156_v20  ;;  %v641_v1 = vmul.f32 1e+09, %v1693_v62 }
  0x2e   :  { %1798 = vmatmul.mubr.msk.f32.vlgmr.msra.gmra.mxu0 %vm65_vm0, %v2123_v5  ;;  %1800 = vmatprep.subr.mxu0 %v2076_v6  ;;  %p2052_p4 = por %p2051_p3, %p2050_p2 }
  0x2f   :  { %1802 = vmatprep.mubr.msk.f32.mxu0 %vm2077_vm1, %v2076_v6 }
  0x30   :  { %p2053_p5 = pnand %p2052_p4, %p2046_p1 }
  0xee   :  { %v1799_v8 = vpop.f32.mrf.mxu0 }
  0xef   :  { %v2133_v9 = vadd.f32 %v1799_v8, %v1681_v7 }
  0xf0   :  { %v138_v10 = vpop.f32.mrf.mxu0 }
  0xf1   :  { %v139_v11 = vadd.f32 %v1681_v7, %v138_v10  ;;  %v645_v7 = vrot.slane %v641_v1, %v156_v20 }
  0xf3   :  { %326 = vrot.lane.b32.xlu1 %v139_v11, %s2078_s0  ;;  %159 = vrot.lane.b32.xlu0 %v139_v11, %s2079_s2 }
  0xf7   :  { %328 = vrot.lane.b32.xlu0 %v139_v11, %s2080_s28 }
 0x165   :  { %v160_v12 = vpop.permute.xlu0 %159  ;;  %v327_v14 = vpop.permute.xlu1 %326 }
 0x166   :  { %1801 = vmatpush3.xpose.msk.msra.mxu0 %vm161_vm2, %v160_v12 }
 0x167   :  { %1810 = vmatprep.subr.mxu0 %v2076_v6 }
 0x169   :  { %1803 = vmatmul.mubr.msk.f32.vlgmr.msra.gmra.mxu0 %vm161_vm2, %v139_v11  ;;  %v329_v13 = vpop.permute.xlu0 %328 }
 0x16a   :  { %1811 = vmatpush3.xpose.msk.msra.mxu0 %vm161_vm2, %v329_v13  ;;  %1812 = vmatprep.mubr.msk.f32.mxu0 %vm2077_vm1, %v2076_v6 }
 0x16b   :  { %1820 = vmatprep.subr.mxu0 %v2076_v6 }
 0x16d   :  { %1813 = vmatmul.mubr.msk.f32.vlgmr.msra.gmra.mxu0 %vm161_vm2, %v327_v14 }
 0x16e   :  { %1824 = vmatprep.mubr.msk.f32.mxu0 %vm2077_vm1, %v2076_v6  ;;  %1821 = vmatpush3.msra.mxu0 %v150_v52 }
 0x16f   :  { %1822 = vmatprep.subr.mxu0 %v2076_v6 }
 0x170   :  { %1823 = vmatpush3.msra.mxu0 %v149_v53 }
 0x171   :  { %1834 = vmatprep.subr.mxu0 %v2076_v6 }
 0x229   :  { %v232_v22 = vpop.f32.mrf.mxu0 }
 0x22a   :  { %v236_v23 = vmul.f32 0.25, %v232_v22 }
 0x22b   :  { %v1804_v24 = vpop.f32.mrf.mxu0 }
 0x22c   :  { %v237_v25 = vadd.f32 %v236_v23, %v157_v21 }
 0x22d   :  { %v400_v26 = vpop.f32.mrf.mxu0 }
 0x22e   :  { %v404_v27 = vmul.f32 0.25, %v400_v26  ;;  %v239_v28 = vsel %vm238_vm3, %v237_v25, -inf }
 0x22f   :  { %240 = vmax.xlane.f32.xlu1 %v239_v28  ;;  %v1814_v29 = vpop.f32.mrf.mxu0 }
 0x230   :  { %v405_v30 = vadd.f32 %v404_v27, %v157_v21 }
 0x232   :  { %v406_v31 = vsel %vm238_vm3, %v405_v30, -inf }
 0x233   :  { %407 = vmax.xlane.f32.xlu0 %v406_v31 }
 0x2b8   :  { %v241_v32 = vpop.xlane.xlu1 %240 }
 0x2b9   :  { %v242_v33 = vsub.f32 %v237_v25, %v241_v32 }
 0x2bb   :  { %v243_v34 = vmul.f32 1.442695, %v242_v33 }
 0x2bc   :  { %v408_v35 = vpop.xlane.xlu0 %407 }
 0x2bd   :  { %1949 = vpow2.f32 %v243_v34  ;;  %v409_v36 = vsub.f32 %v405_v30, %v408_v35 }
 0x2bf   :  { %v410_v37 = vmul.f32 1.442695, %v409_v36 }
 0x2c1   :  { %1951 = vpow2.f32 %v410_v37 }
 0x2ca   :  { %v1950_v38 = vpop.eup %1949 }
 0x2cb   :  { %v245_v39 = vsel %vm238_vm3, %v1950_v38, 0.0 }
 0x2cc   :  { %246 = vadd.xlane.f32.xlu0 %v245_v39 }
 0x2ce   :  { %v1952_v40 = vpop.eup %1951 }
 0x2cf   :  { %v412_v41 = vsel %vm238_vm3, %v1952_v40, 0.0 }
 0x2d0   :  { %413 = vadd.xlane.f32.xlu1 %v412_v41 }
 0x2e1   :  { %417 = vrot.lane.b32.xlu1 %v139_v11, %s2081_s29 }
 0x2e2   :  { %250 = vrot.lane.b32.xlu0 %v139_v11, %s2082_s30 }
 0x2e5   :  { %647 = vrot.lane.b32.xlu1 %v2133_v9, %s2079_s2 }
 0x2e6   :  { %814 = vrot.lane.b32.xlu0 %v2133_v9, %s2080_s28 }
 0x2e9   :  { %812 = vrot.lane.b32.xlu1 %v2133_v9, %s2078_s0 }
 0x355   :  { %v247_v42 = vpop.xlane.xlu0 %246 }
 0x356   :  { %1953 = vrcp.f32 %v247_v42 }
 0x359   :  { %v414_v43 = vpop.xlane.xlu1 %413  ;;  %v251_v44 = vpop.permute.xlu0 %250 }
 0x35a   :  { %1955 = vrcp.f32 %v414_v43  ;;  %1806 = vmatpush3.msra.mxu1 %v251_v44 }
 0x35b   :  { %1815 = vmatprep.subr.mxu1 %v2076_v6 }
 0x35d   :  { %v418_v47 = vpop.permute.xlu1 %417  ;;  %v815_v59 = vpop.permute.xlu0 %814 }
 0x361   :  { %v648_v57 = vpop.permute.xlu1 %647 }
 0x363   :  { %v1954_v45 = vpop.eup %1953 }
 0x364   :  { %v249_v46 = vmul.f32 %v1954_v45, %v1950_v38 }
 0x365   :  { %v813_v60 = vpop.permute.xlu1 %812 }
 0x366   :  { %1808 = vmatmul.mubr.msk.f32.vlgmr.msra.gmra.mxu1 %vm238_vm3, %v249_v46 }
 0x367   :  { %v1956_v48 = vpop.eup %1955  ;;  %1816 = vmatpush3.msra.mxu1 %v418_v47  ;;  %1817 = vmatprep.mubr.msk.f32.mxu1 %vm2077_vm1, %v2076_v6 }
 0x368   :  { %v416_v49 = vmul.f32 %v1956_v48, %v1952_v40  ;;  %1827 = vmatprep.subr.mxu1 %v2076_v6 }
 0x36a   :  { %1818 = vmatmul.mubr.msk.f32.vlgmr.msra.gmra.mxu1 %vm238_vm3, %v416_v49 }
 0x36b   :  { %1828 = vmatpush3.msra.mxu1 %v2170_v50  ;;  %1831 = vmatprep.mubr.msk.f32.mxu1 %vm2077_vm1, %v2076_v6 }
 0x36c   :  { %1829 = vmatprep.subr.mxu1 %v2076_v6 }
 0x36d   :  { %1830 = vmatpush3.msra.mxu1 %v2177_v51 }
 0x36e   :  { %1839 = vmatprep.subr.mxu1 %v2076_v6 }
 0x426   :  { %v322_v54 = vpop.f32.mrf.mxu1 }
 0x427   :  { %1832 = vmatmul.mubr.msk.f32.vlgmr.msra.gmra.mxu1 %vm161_vm2, %v322_v54 }
 0x428   :  { %v1809_v55 = vpop.f32.mrf.mxu1  ;;  %1841 = vmatprep.mubr.msk.f32.mxu1 %vm2077_vm1, %v2076_v6 }
 0x429   :  { %v1704_v55 = vld [vmem:[#allocation7 + $0x58] ss:$0 sm:$0xff] }
 0x42a   :  { %v489_v56 = vpop.f32.mrf.mxu1 }
 0x42b   :  { %1825 = vmatmul.mubr.msk.f32.vlgmr.msra.gmra.mxu0 %vm161_vm2, %v489_v56 }
 0x42c   :  { %1835 = vmatpush3.xpose.msk.msra.mxu0 %vm161_vm2, %v648_v57  ;;  %v1819_v58 = vpop.f32.mrf.mxu1  ;;  %1836 = vmatprep.mubr.msk.f32.mxu0 %vm2077_vm1, %v2076_v6 }
 0x42d   :  { %1844 = vmatprep.subr.mxu0 %v2076_v6 }
 0x42f   :  { %1837 = vmatmul.mubr.msk.f32.vlgmr.msra.gmra.mxu0 %vm161_vm2, %v2133_v9 }
 0x430   :  { %1845 = vmatpush3.xpose.msk.msra.mxu0 %vm161_vm2, %v815_v59  ;;  %1846 = vmatprep.mubr.msk.f32.mxu0 %vm2077_vm1, %v2076_v6 }
 0x431   :  { %1854 = vmatprep.subr.mxu0 %v2076_v6 }
 0x433   :  { %1847 = vmatmul.mubr.msk.f32.vlgmr.msra.gmra.mxu0 %vm161_vm2, %v813_v60 }
 0x434   :  { %1855 = vmatpush3.msra.mxu0 %v150_v52  ;;  %1858 = vmatprep.mubr.msk.f32.mxu0 %vm2077_vm1, %v2076_v6  ;;  %v1703_v52 = vld [vmem:[#allocation7 + $0x50] ss:$0 sm:$0xff] }
 0x435   :  { %1856 = vmatprep.subr.mxu0 %v2076_v6 }
 0x436   :  { %1857 = vmatpush3.msra.mxu0 %v149_v53 }
 0x4e7   :  { %v635_v63 = vpop.f32.mrf.mxu1 }
 0x4e9   :  { %v1833_v0 = vpop.f32.mrf.mxu1 }
 0x4eb   :  { %v562_v3 = vpop.f32.mrf.mxu0 }
 0x4ec   :  { %v636_v21 = vadd.f32 %v635_v63, %v562_v3 }
 0x4ed   :  { %v1826_v4 = vpop.f32.mrf.mxu0 }
 0x4ee   :  { %v1130_v20 = vadd.f32 %v2207_v18, %v636_v21 }
 0x4ef   :  { %v719_v8 = vpop.f32.mrf.mxu0 }
 0x4f0   :  { %v723_v10 = vmul.f32 0.25, %v719_v8  ;;  %v1132_v22 = vadd.f32 %v1130_v20, %v2119_v2  ;;  %v1297_v20 = vld [vmem:[#allocation7 + $0xf8] sm:$0xff] }
 0x4f1   :  { %v1838_v11 = vpop.f32.mrf.mxu0 }
 0x4f2   :  { %v724_v12 = vadd.f32 %v723_v10, %v645_v7  ;;  %v1136_v23 = vsel %vm65_vm0, %v1132_v22, 0.0  ;;  %v1178_v10 = vld [vmem:[#allocation7 + $0x78] sm:$0xff]  ;;  %v1177_v11 = vld [vmem:[#allocation7 + $0x70] sm:$0xff] }
 0x4f3   :  { %v886_v13 = vpop.f32.mrf.mxu0  ;;  %1868 = vmatprep.subr.mxu0 %v1178_v10 }
 0x4f4   :  { %v890_v14 = vmul.f32 0.25, %v886_v13  ;;  %v725_v15 = vsel %vm238_vm3, %v724_v12, -inf  ;;  %v1175_v13 = vld [vmem:[#allocation7 + $0x60] sm:$0xff] }
 0x4f5   :  { %726 = vmax.xlane.f32.xlu0 %v725_v15  ;;  %v1848_v16 = vpop.f32.mrf.mxu0 }
 0x4f6   :  { %v891_v17 = vadd.f32 %v890_v14, %v645_v7 }
 0x4f8   :  { %v892_v19 = vsel %vm238_vm3, %v891_v17, -inf }
 0x4f9   :  { %893 = vmax.xlane.f32.xlu1 %v892_v19 }
 0x50a   :  { %736 = vrot.lane.b32.xlu1 %v2133_v9, %s2082_s30 }
 0x52e   :  { %1137 = vadd.xlane.f32.xlu1 %v1136_v23  ;;  %v1295_v23 = vld [vmem:[#allocation7 + $0xe8] sm:$0xff] }
 0x57e   :  { %v727_v24 = vpop.xlane.xlu0 %726 }
 0x57f   :  { %v728_v25 = vsub.f32 %v724_v12, %v727_v24  ;;  %v1176_v12 = vld [vmem:[#allocation7 + $0x68] sm:$0xff]  ;;  %v1294_v24 = vld [vmem:[#allocation7 + $0xe0] sm:$0xff] }
 0x581   :  { %v729_v26 = vmul.f32 1.442695, %v728_v25  ;;  %v1293_v25 = vld [vmem:[#allocation7 + $0xd8] sm:$0xff] }
 0x582   :  { %v894_v27 = vpop.xlane.xlu1 %893 }
 0x583   :  { %1957 = vpow2.f32 %v729_v26  ;;  %v895_v28 = vsub.f32 %v891_v17, %v894_v27  ;;  %v1292_v26 = vld [vmem:[#allocation7 + $0xd0] sm:$0xff]  ;;  %v1291_v27 = vld [vmem:[#allocation7 + $0xc8] sm:$0xff] }
 0x585   :  { %v896_v29 = vmul.f32 1.442695, %v895_v28  ;;  %v1290_v28 = vld [vmem:[#allocation7 + $0xc0] sm:$0xff] }
 0x586   :  { %v737_v30 = vpop.permute.xlu1 %736 }
 0x587   :  { %1959 = vpow2.f32 %v896_v29  ;;  %1840 = vmatpush3.msra.mxu1 %v737_v30  ;;  %v1289_v29 = vld [vmem:[#allocation7 + $0xb8] sm:$0xff]  ;;  %v1288_v30 = vld [vmem:[#allocation7 + $0xb0] sm:$0xff] }
 0x588   :  { %1849 = vmatprep.subr.mxu1 %v2076_v6 }
 0x590   :  { %v1958_v31 = vpop.eup %1957 }
 0x591   :  { %v731_v32 = vsel %vm238_vm3, %v1958_v31, 0.0 }
 0x592   :  { %732 = vadd.xlane.f32.xlu0 %v731_v32  ;;  %v1286_v32 = vld [vmem:[#allocation7 + $0xa0] sm:$0xff] }
 0x594   :  { %v1960_v2 = vpop.eup %1959 }
 0x595   :  { %v898_v33 = vsel %vm238_vm3, %v1960_v2, 0.0 }
 0x596   :  { %899 = vadd.xlane.f32.xlu0 %v898_v33  ;;  %v1284_v33 = vld [vmem:[#allocation7 + $0x90] sm:$0xff] }
 0x5ac   :  { %903 = vrot.lane.b32.xlu0 %v2133_v9, %s2081_s29 }
 0x5b7   :  { %v1138_v34 = vpop.xlane.xlu1 %1137 }
 0x5b8   :  { %v1143_v35 = vmul.f32 0.03125, %v1138_v34  ;;  %v1283_v34 = vld [vmem:[#allocation7 + $0x88] sm:$0xff] }
 0x5ba   :  { %v1145_v36 = vsub.f32 %v1132_v22, %v1143_v35  ;;  %v1296_v22 = vld [vmem:[#allocation7 + $0xf0] sm:$0xff]  ;;  %v1705_v35 = vld [vmem:[#allocation7 + $0x80] ss:$0 sm:$0xff] }
 0x5bc   :  { %v1147_v37 = vmul.f32 %v1145_v36, %v1145_v36 }
 0x5be   :  { %v1149_v38 = vsel %vm65_vm0, %v1147_v37, 0.0 }
 0x5bf   :  { %1150 = vadd.xlane.f32.xlu1 %v1149_v38 }
 0x61b   :  { %v733_v39 = vpop.xlane.xlu0 %732 }
 0x61c   :  { %1961 = vrcp.f32 %v733_v39 }
 0x61f   :  { %v900_v40 = vpop.xlane.xlu0 %899 }
 0x620   :  { %1963 = vrcp.f32 %v900_v40 }
 0x623   :  { %v904_v43 = vpop.permute.xlu0 %903 }
 0x629   :  { %v1962_v41 = vpop.eup %1961 }
 0x62a   :  { %v735_v42 = vmul.f32 %v1962_v41, %v1958_v31  ;;  %v1287_v31 = vld [vmem:[#allocation7 + $0xa8] sm:$0xff] }
 0x62c   :  { %1842 = vmatmul.mubr.msk.f32.vlgmr.msra.gmra.mxu1 %vm238_vm3, %v735_v42 }
 0x62d   :  { %v1964_v44 = vpop.eup %1963  ;;  %1850 = vmatpush3.msra.mxu1 %v904_v43  ;;  %1851 = vmatprep.mubr.msk.f32.mxu1 %vm2077_vm1, %v2076_v6 }
 0x62e   :  { %v902_v9 = vmul.f32 %v1964_v44, %v1960_v2  ;;  %1861 = vmatprep.subr.mxu1 %v2076_v6  ;;  %v1285_v2 = vld [vmem:[#allocation7 + $0x98] sm:$0xff] }
 0x630   :  { %1852 = vmatmul.mubr.msk.f32.vlgmr.msra.gmra.mxu1 %vm238_vm3, %v902_v9 }
 0x631   :  { %1862 = vmatpush3.msra.mxu1 %v2170_v50  ;;  %1865 = vmatprep.mubr.msk.f32.mxu1 %vm2077_vm1, %v2076_v6 }
 0x632   :  { %1863 = vmatprep.subr.mxu1 %v2076_v6 }
 0x633   :  { %1864 = vmatpush3.msra.mxu1 %v2177_v51 }
 0x648   :  { %v1151_v45 = vpop.xlane.xlu1 %1150 }
 0x649   :  { %v1155_v46 = vmul.f32 0.03125, %v1151_v45 }
 0x64b   :  { %v1157_v47 = vadd.f32 1e-05, %v1155_v46 }
 0x64d   :  { %1965 = vrsqrt.f32 %v1157_v47 }
 0x65a   :  { %v1966_v48 = vpop.eup %1965 }
 0x65b   :  { %v1161_v49 = vmul.f32 %v1966_v48, %v1145_v36 }
 0x65d   :  { %v1167_v54 = vmul.f32 %v1703_v52, %v1161_v49 }
 0x65f   :  { %v2229_v57 = vadd.f32 %v1704_v55, %v1167_v54 }
 0x6ec   :  { %v808_v53 = vpop.f32.mrf.mxu1 }
 0x6ed   :  { %1866 = vmatmul.mubr.msk.f32.vlgmr.msra.gmra.mxu1 %vm161_vm2, %v808_v53 }
 0x6ee   :  { %v1843_v50 = vpop.f32.mrf.mxu1 }
 0x6f0   :  { %v975_v56 = vpop.f32.mrf.mxu1 }
 0x6f1   :  { %1859 = vmatmul.mubr.msk.f32.vlgmr.msra.gmra.mxu0 %vm161_vm2, %v975_v56 }
 0x6f2   :  { %v1853_v6 = vpop.f32.mrf.mxu1  ;;  %1876 = vmatprep.mubr.msk.f32.mxu0 %vm65_vm0, %v2229_v57  ;;  %1869 = vmatpush3.msra.mxu0 %v1178_v10 }
 0x6f3   :  { %1870 = vmatprep.subr.mxu0 %v1177_v11 }
 0x6f4   :  { %1871 = vmatpush3.msra.mxu0 %v1177_v11 }
 0x6f5   :  { %1872 = vmatprep.subr.mxu0 %v1176_v12 }
 0x6f6   :  { %1873 = vmatpush3.msra.mxu0 %v1176_v12 }
 0x6f7   :  { %1874 = vmatprep.subr.mxu0 %v1175_v13 }
 0x6f8   :  { %1875 = vmatpush3.msra.mxu0 %v1175_v13 }
 0x7ad   :  { %v1121_v51 = vpop.f32.mrf.mxu1 }
 0x7af   :  { %v1867_v58 = vpop.f32.mrf.mxu1 }
 0x7b0   :  { %v1708_v58 = vld [vmem:[#allocation7 + $0x108] ss:$0 sm:$0xff] }
 0x7b1   :  { %v1048_v59 = vpop.f32.mrf.mxu0 }
 0x7b2   :  { %v1122_v60 = vadd.f32 %v1121_v51, %v1048_v59 }
 0x7b3   :  { %v1860_v61 = vpop.f32.mrf.mxu0 }
 0x7b4   :  { %v1131_v62 = vadd.f32 %v2207_v18, %v1122_v60  ;;  %v1298_v18 = vld [vmem:[#allocation7 + $0x100] sm:$0xff] }
 0x7b5   :  { %1879 = vmatprep.subr.mxu1 %v1298_v18 }
 0x7b6   :  { %v1133_v63 = vadd.f32 %v1131_v62, %v2123_v5  ;;  %1880 = vmatpush3.msra.mxu1 %v1298_v18 }
 0x7b7   :  { %1881 = vmatprep.subr.mxu1 %v1297_v20 }
 0x7b8   :  { %v1139_v0 = vsel %vm65_vm0, %v1133_v63, 0.0  ;;  %1882 = vmatpush3.msra.mxu1 %v1297_v20 }
 0x7b9   :  { %1140 = vadd.xlane.f32.xlu0 %v1139_v0  ;;  %1883 = vmatprep.subr.mxu1 %v1296_v22 }
 0x7ba   :  { %1884 = vmatpush3.msra.mxu1 %v1296_v22 }
 0x7bb   :  { %1885 = vmatprep.subr.mxu1 %v1295_v23 }
 0x7bc   :  { %1886 = vmatpush3.msra.mxu1 %v1295_v23 }
 0x7bd   :  { %1887 = vmatprep.subr.mxu1 %v1294_v24 }
 0x7be   :  { %1888 = vmatpush3.msra.mxu1 %v1294_v24 }
 0x7bf   :  { %1889 = vmatprep.subr.mxu1 %v1293_v25 }
 0x7c0   :  { %1890 = vmatpush3.msra.mxu1 %v1293_v25  ;;  %v1709_v25 = vld [vmem:[#allocation7 + $0x110] ss:$0 sm:$0xff] }
 0x7c1   :  { %1891 = vmatprep.subr.mxu1 %v1292_v26 }
 0x7c2   :  { %1892 = vmatpush3.msra.mxu1 %v1292_v26 }
 0x7c3   :  { %1893 = vmatprep.subr.mxu1 %v1291_v27 }
 0x7c4   :  { %1894 = vmatpush3.msra.mxu1 %v1291_v27 }
 0x7c5   :  { %1895 = vmatprep.subr.mxu1 %v1290_v28 }
 0x7c6   :  { %1896 = vmatpush3.msra.mxu1 %v1290_v28 }
 0x7c7   :  { %1897 = vmatprep.subr.mxu1 %v1289_v29 }
 0x7c8   :  { %1898 = vmatpush3.msra.mxu1 %v1289_v29 }
 0x7c9   :  { %1899 = vmatprep.subr.mxu1 %v1288_v30 }
 0x7ca   :  { %1900 = vmatpush3.msra.mxu1 %v1288_v30  ;;  %v1710_v30 = vld [vmem:[#allocation7 + $0x118] ss:$0 sm:$0xff] }
 0x7cb   :  { %1901 = vmatprep.subr.mxu1 %v1287_v31 }
 0x7cc   :  { %1902 = vmatpush3.msra.mxu1 %v1287_v31 }
 0x7cd   :  { %1903 = vmatprep.subr.mxu1 %v1286_v32 }
 0x7ce   :  { %1904 = vmatpush3.msra.mxu1 %v1286_v32 }
 0x7cf   :  { %1905 = vmatprep.subr.mxu1 %v1285_v2 }
 0x7d0   :  { %1906 = vmatpush3.msra.mxu1 %v1285_v2 }
 0x7d1   :  { %1907 = vmatprep.subr.mxu1 %v1284_v33 }
 0x7d2   :  { %1908 = vmatpush3.msra.mxu1 %v1284_v33  ;;  %v1711_v33 = vld [vmem:[#allocation7 + $0x140] ss:$0 sm:$0xff] }
 0x7d3   :  { %1909 = vmatprep.subr.mxu1 %v1283_v34 }
 0x7d4   :  { %1910 = vmatpush3.msra.mxu1 %v1283_v34 }
 0x842   :  { %v1141_v1 = vpop.xlane.xlu0 %1140 }
 0x843   :  { %v1144_v3 = vmul.f32 0.03125, %v1141_v1 }
 0x845   :  { %v1146_v4 = vsub.f32 %v1133_v63, %v1144_v3 }
 0x847   :  { %v1148_v7 = vmul.f32 %v1146_v4, %v1146_v4 }
 0x849   :  { %v1152_v8 = vsel %vm65_vm0, %v1148_v7, 0.0 }
 0x84a   :  { %1153 = vadd.xlane.f32.xlu0 %v1152_v8 }
 0x8d3   :  { %v1154_v5 = vpop.xlane.xlu0 %1153 }
 0x8d4   :  { %v1156_v14 = vmul.f32 0.03125, %v1154_v5 }
 0x8d6   :  { %v1158_v15 = vadd.f32 1e-05, %v1156_v14  ;;  %v1426_v14 = vld [vmem:[#allocation7 + $0x138] sm:$0xff] }
 0x8d7   :  { %1914 = vmatprep.subr.mxu0 %v1426_v14 }
 0x8d8   :  { %1967 = vrsqrt.f32 %v1158_v15  ;;  %v1425_v15 = vld [vmem:[#allocation7 + $0x130] sm:$0xff] }
 0x8e5   :  { %v1968_v16 = vpop.eup %1967 }
 0x8e6   :  { %v1162_v17 = vmul.f32 %v1968_v16, %v1146_v4  ;;  %v1424_v16 = vld [vmem:[#allocation7 + $0x128] sm:$0xff] }
 0x8e8   :  { %v1168_v19 = vmul.f32 %v1703_v52, %v1162_v17  ;;  %v1423_v17 = vld [vmem:[#allocation7 + $0x120] sm:$0xff] }
 0x8ea   :  { %v2238_v21 = vadd.f32 %v1704_v55, %v1168_v19 }
 0x8ec   :  { %1877 = vmatmul.mubr.msk.f32.vlgmr.msra.gmra.mxu0 %vm65_vm0, %v2238_v21 }
 0x8ed   :  { %1915 = vmatpush3.msra.mxu0 %v1426_v14 }
 0x8ee   :  { %1916 = vmatprep.subr.mxu0 %v1425_v15 }
 0x8ef   :  { %1917 = vmatpush3.msra.mxu0 %v1425_v15 }
 0x8f0   :  { %1918 = vmatprep.subr.mxu0 %v1424_v16 }
 0x8f1   :  { %1919 = vmatpush3.msra.mxu0 %v1424_v16  ;;  %v1714_v16 = vld [vmem:[#allocation7 + $0x148] ss:$0 sm:$0xff] }
 0x8f2   :  { %1920 = vmatprep.subr.mxu0 %v1423_v17 }
 0x8f3   :  { %1921 = vmatpush3.msra.mxu0 %v1423_v17 }
 0x9ac   :  { %v1878_v36 = vpop.f32.mrf.mxu0 }
 0x9ad   :  { %v1262_v37 = vadd.f32 %v1878_v36, %v1705_v35 }
 0x9ae   :  { %v1256_v38 = vpop.f32.mrf.mxu0 }
 0x9af   :  { %v1266_v39 = vmul.f32 %v1262_v37, %v1262_v37  ;;  %v1257_v40 = vadd.f32 %v1705_v35, %v1256_v38 }
 0x9b1   :  { %v1268_v41 = vmul.f32 %v1266_v39, %v1262_v37  ;;  %v1265_v42 = vmul.f32 %v1257_v40, %v1257_v40 }
 0x9b3   :  { %v1270_v43 = vmul.f32 0.044715, %v1268_v41  ;;  %v1267_v44 = vmul.f32 %v1265_v42, %v1257_v40 }
 0x9b5   :  { %v1272_v9 = vadd.f32 %v1270_v43, %v1262_v37  ;;  %v1269_v45 = vmul.f32 0.044715, %v1267_v44 }
 0x9b7   :  { %v1274_v46 = vmul.f32 0.7978846, %v1272_v9  ;;  %v1271_v47 = vadd.f32 %v1269_v45, %v1257_v40 }
 0x9b9   :  { %1969 = vtanh.f32 %v1274_v46  ;;  %v1273_v48 = vmul.f32 0.7978846, %v1271_v47 }
 0x9bb   :  { %1971 = vtanh.f32 %v1273_v48 }
 0x9c6   :  { %v1970_v49 = vpop.eup %1969 }
 0x9c7   :  { %v1278_v52 = vadd.f32 1.0, %v1970_v49 }
 0x9c8   :  { %v1972_v53 = vpop.eup %1971 }
 0x9c9   :  { %v1277_v54 = vadd.f32 1.0, %v1972_v53  ;;  %v1280_v55 = vmul.f32 0.5, %v1278_v52 }
 0x9cb   :  { %v1279_v50 = vmul.f32 0.5, %v1277_v54  ;;  %v1282_v6 = vmul.f32 %v1280_v55, %v1262_v37 }
 0x9cd   :  { %v1281_v56 = vmul.f32 %v1279_v50, %v1257_v40 }
 0x9cf   :  { %1911 = vmatprep.mubr.f32.mxu1 %v1281_v56 }
 0x9d0   :  { %1912 = vmatmul.mubr.f32.vlgmr.msra.gmra.mxu1 %v1282_v6 }
 0xa90   :  { %v1913_v51 = vpop.f32.mrf.mxu1 }
 0xa91   :  { %v1375_v59 = vadd.f32 %v1913_v51, %v2238_v21 }
 0xa92   :  { %v1365_v60 = vpop.f32.mrf.mxu1 }
 0xa93   :  { %v1374_v61 = vadd.f32 %v1365_v60, %v2229_v57  ;;  %v1382_v62 = vadd.f32 %v1708_v58, %v1375_v59 }
 0xa95   :  { %v1388_v63 = vsel %vm65_vm0, %v1382_v62, 0.0  ;;  %v1381_v0 = vadd.f32 %v1708_v58, %v1374_v61 }
 0xa96   :  { %1389 = vadd.xlane.f32.xlu0 %v1388_v63 }
 0xa97   :  { %v1385_v1 = vsel %vm65_vm0, %v1381_v0, 0.0 }
 0xa98   :  { %1386 = vadd.xlane.f32.xlu1 %v1385_v1 }
 0xb1f   :  { %v1390_v3 = vpop.xlane.xlu0 %1389 }
 0xb20   :  { %v1392_v4 = vmul.f32 0.03125, %v1390_v3 }
 0xb21   :  { %v1387_v7 = vpop.xlane.xlu1 %1386 }
 0xb22   :  { %v1394_v8 = vsub.f32 %v1382_v62, %v1392_v4  ;;  %v1391_v10 = vmul.f32 0.03125, %v1387_v7  ;;  %v1574_v4 = vld [vmem:[#allocation7 + $0x170] sm:$0xff]  ;;  %v1573_v7 = vld [vmem:[#allocation7 + $0x168] sm:$0xff] }
 0xb23   :  { %1925 = vmatprep.subr.mxu0 %v1574_v4 }
 0xb24   :  { %v1393_v11 = vsub.f32 %v1381_v0, %v1391_v10  ;;  %v1396_v12 = vmul.f32 %v1394_v8, %v1394_v8  ;;  %v1571_v10 = vld [vmem:[#allocation7 + $0x158] sm:$0xff] }
 0xb26   :  { %v1400_v13 = vsel %vm65_vm0, %v1396_v12, 0.0  ;;  %v1395_v5 = vmul.f32 %v1393_v11, %v1393_v11 }
 0xb27   :  { %1401 = vadd.xlane.f32.xlu0 %v1400_v13 }
 0xb28   :  { %v1397_v57 = vsel %vm65_vm0, %v1395_v5, 0.0 }
 0xb29   :  { %1398 = vadd.xlane.f32.xlu1 %v1397_v57 }
 0xbb0   :  { %v1402_v19 = vpop.xlane.xlu0 %1401 }
 0xbb1   :  { %v1404_v21 = vmul.f32 0.03125, %v1402_v19 }
 0xbb2   :  { %v1399_v18 = vpop.xlane.xlu1 %1398 }
 0xbb3   :  { %v1406_v20 = vadd.f32 1e-05, %v1404_v21  ;;  %v1403_v22 = vmul.f32 0.03125, %v1399_v18 }
 0xbb5   :  { %1973 = vrsqrt.f32 %v1406_v20  ;;  %v1405_v23 = vadd.f32 1e-05, %v1403_v22  ;;  %v1715_v20 = vld [vmem:[#allocation7 + $0x150] ss:$0 sm:$0xff] }
 0xbb7   :  { %1975 = vrsqrt.f32 %v1405_v23 }
 0xbc2   :  { %v1974_v24 = vpop.eup %1973 }
 0xbc3   :  { %v1410_v26 = vmul.f32 %v1974_v24, %v1394_v8  ;;  %v1572_v8 = vld [vmem:[#allocation7 + $0x160] sm:$0xff] }
 0xbc4   :  { %v1976_v27 = vpop.eup %1975 }
 0xbc5   :  { %v1409_v28 = vmul.f32 %v1976_v27, %v1393_v11  ;;  %v1416_v29 = vmul.f32 %v1709_v25, %v1410_v26 }
 0xbc7   :  { %v1415_v31 = vmul.f32 %v1709_v25, %v1409_v28  ;;  %v1422_v2 = vadd.f32 %v1710_v30, %v1416_v29  ;;  %v1716_v25 = vld [vmem:[#allocation7 + $0x178] ss:$0 sm:$0xff] }
 0xbc9   :  { %v1421_v32 = vadd.f32 %v1710_v30, %v1415_v31 }
 0xbcb   :  { %1922 = vmatprep.mubr.msk.f32.mxu0 %vm65_vm0, %v1421_v32 }
 0xbcc   :  { %1923 = vmatmul.mubr.msk.f32.vlgmr.msra.gmra.mxu0 %vm65_vm0, %v1422_v2 }
 0xbcd   :  { %1926 = vmatpush3.msra.mxu0 %v1574_v4 }
 0xbce   :  { %1927 = vmatprep.subr.mxu0 %v1573_v7 }
 0xbcf   :  { %1928 = vmatpush3.msra.mxu0 %v1573_v7 }
 0xbd0   :  { %1929 = vmatprep.subr.mxu0 %v1572_v8 }
 0xbd1   :  { %1930 = vmatpush3.msra.mxu0 %v1572_v8 }
 0xbd2   :  { %1931 = vmatprep.subr.mxu0 %v1571_v10 }
 0xbd3   :  { %1932 = vmatpush3.msra.mxu0 %v1571_v10 }
 0xc8c   :  { %v1924_v34 = vpop.f32.mrf.mxu0 }
 0xc8d   :  { %v1510_v35 = vadd.f32 %v1924_v34, %v1711_v33 }
 0xc8e   :  { %v1504_v36 = vpop.f32.mrf.mxu0 }
 0xc8f   :  { %v1514_v37 = vmul.f32 %v1510_v35, %v1510_v35  ;;  %v1505_v38 = vadd.f32 %v1711_v33, %v1504_v36 }
 0xc91   :  { %v1516_v39 = vmul.f32 %v1514_v37, %v1510_v35  ;;  %v1513_v40 = vmul.f32 %v1505_v38, %v1505_v38 }
 0xc93   :  { %v1518_v41 = vmul.f32 0.044715, %v1516_v39  ;;  %v1515_v42 = vmul.f32 %v1513_v40, %v1505_v38 }
 0xc95   :  { %v1520_v43 = vadd.f32 %v1518_v41, %v1510_v35  ;;  %v1517_v44 = vmul.f32 0.044715, %v1515_v42 }
 0xc97   :  { %v1519_v9 = vadd.f32 %v1517_v44, %v1505_v38  ;;  %v1522_v45 = vmul.f32 0.7978846, %v1520_v43 }
 0xc99   :  { %1977 = vtanh.f32 %v1522_v45  ;;  %v1521_v46 = vmul.f32 0.7978846, %v1519_v9 }
 0xc9b   :  { %1979 = vtanh.f32 %v1521_v46 }
 0xca6   :  { %v1978_v47 = vpop.eup %1977 }
 0xca7   :  { %v1526_v48 = vadd.f32 1.0, %v1978_v47 }
 0xca8   :  { %v1980_v49 = vpop.eup %1979 }
 0xca9   :  { %v1528_v52 = vmul.f32 0.5, %v1526_v48  ;;  %v1525_v53 = vadd.f32 1.0, %v1980_v49 }
 0xcab   :  { %v1530_v54 = vmul.f32 %v1528_v52, %v1510_v35  ;;  %v1527_v55 = vmul.f32 0.5, %v1525_v53 }
 0xcad   :  { %v1536_v50 = vsel %vm65_vm0, %v1530_v54, 0.0  ;;  %v1529_v56 = vmul.f32 %v1527_v55, %v1505_v38 }
 0xcae   :  { %1537 = vadd.xlane.f32.xlu0 %v1536_v50 }
 0xcaf   :  { %v1533_v6 = vsel %vm65_vm0, %v1529_v56, 0.0 }
 0xcb0   :  { %1534 = vadd.xlane.f32.xlu1 %v1533_v6 }
 0xd37   :  { %v1538_v51 = vpop.xlane.xlu0 %1537 }
 0xd38   :  { %v1540_v58 = vmul.f32 0.03125, %v1538_v51 }
 0xd39   :  { %v1535_v59 = vpop.xlane.xlu1 %1534 }
 0xd3a   :  { %v1542_v60 = vsub.f32 %v1530_v54, %v1540_v58  ;;  %v1539_v61 = vmul.f32 0.03125, %v1535_v59 }
 0xd3c   :  { %v1541_v62 = vsub.f32 %v1529_v56, %v1539_v61  ;;  %v1544_v63 = vmul.f32 %v1542_v60, %v1542_v60 }
 0xd3e   :  { %v1548_v0 = vsel %vm65_vm0, %v1544_v63, 0.0  ;;  %v1543_v1 = vmul.f32 %v1541_v62, %v1541_v62 }
 0xd3f   :  { %1549 = vadd.xlane.f32.xlu0 %v1548_v0 }
 0xd40   :  { %v1545_v3 = vsel %vm65_vm0, %v1543_v1, 0.0 }
 0xd41   :  { %1546 = vadd.xlane.f32.xlu1 %v1545_v3 }
 0xdc8   :  { %v1550_v11 = vpop.xlane.xlu0 %1549 }
 0xdc9   :  { %v1552_v12 = vmul.f32 0.03125, %v1550_v11 }
 0xdca   :  { %v1547_v13 = vpop.xlane.xlu1 %1546 }
 0xdcb   :  { %v1554_v5 = vadd.f32 1e-05, %v1552_v12  ;;  %v1551_v57 = vmul.f32 0.03125, %v1547_v13 }
 0xdcd   :  { %1981 = vrsqrt.f32 %v1554_v5  ;;  %v1553_v14 = vadd.f32 1e-05, %v1551_v57 }
 0xdcf   :  { %1983 = vrsqrt.f32 %v1553_v14 }
 0xdda   :  { %v1982_v15 = vpop.eup %1981 }
 0xddb   :  { %v1558_v17 = vmul.f32 %v1982_v15, %v1542_v60 }
 0xddc   :  { %v1984_v19 = vpop.eup %1983 }
 0xddd   :  { %v1557_v21 = vmul.f32 %v1984_v19, %v1541_v62  ;;  %v1564_v18 = vmul.f32 %v1714_v16, %v1558_v17 }
 0xddf   :  { %v1563_v22 = vmul.f32 %v1714_v16, %v1557_v21  ;;  %v1570_v24 = vadd.f32 %v1715_v20, %v1564_v18 }
 0xde1   :  { %v1569_v23 = vadd.f32 %v1715_v20, %v1563_v22 }
 0xde3   :  { %1933 = vmatprep.mubr.msk.f32.mxu0 %vm65_vm0, %v1569_v23 }
 0xde4   :  { %1934 = vmatmul.mubr.msk.f32.vlgmr.msra.gmra.mxu0 %vm65_vm0, %v1570_v24 }
 0xea4   :  { %v1935_v26 = vpop.f32.mrf.mxu0 }
 0xea5   :  { %v1658_v27 = vadd.f32 %v1935_v26, %v1716_v25 }
 0xea6   :  { %v1652_v28 = vpop.f32.mrf.mxu0 }
 0xea7   :  { %1662 = vst [vmem:[#allocation8 + $0x8] sm:$0xff] %v1658_v27  ;;  %v1653_v29 = vadd.f32 %v1716_v25, %v1652_v28 }
 0xea9   :  { %1661 = vst [vmem:[#allocation8] sm:$0xff] %v1653_v29 }
 0xeaa   :  { %2056 = shalt.err (!%p2053_p5)
}
 0xeab   :  { %1674 = dma.vmem_to_hbm [thread:$0]  %s1669_s5, 256, %s2265_s3, [#allocation4], %s2073_s20, %s2073_s20, %s2074_s21  }
 0xeac   :  { %2069 = dma.done.wait [#allocation4], 256  }
 0xead   :  { %2070 = vsyncadd [#allocation4], 4294967040 }
 0xeae   :  { %1678 = vsyncpa [#allocation3], 1 }
 0xeaf   :  { %1679 = vsyncpa [#allocation6], 1 }
 0xeb0   :  { %1680 = vsyncpa [#allocation4], 1 }

</bundles_post_ra>
